<compile_context>
chip_gen: v6e
topology: v6e:2x2x1
jax: 0.10.0
libtpu: 0.0.40
codegen_flags: <defaults>
</compile_context>

<pallas_src>
import jax
import jax.numpy as jnp
from jax.experimental import pallas as pl
from jax.experimental.pallas import tpu as pltpu

_LANES = 128
_MAX_COLS = 4096  # cap the lane dim so the wrapper reshape stays cheap/sane


def _dma_copy_kernel(x_ref, o_ref, sem):
    # Single HBM -> HBM DMA: no VMEM staging, no vector load/store slots used.
    cp = pltpu.make_async_copy(x_ref, o_ref, sem)
    cp.start()
    cp.wait()


def _lane_dense_shape(n: int, H: int, W: int) -> tuple:
    """Pick a (rows, cols) view of the flat image with the widest lane dim."""
    if n % _LANES != 0:
        # Non-128-multiple image: keep the natural (H, W) view; the full-array
        # DMA is still a single contiguous descriptor, so this is only a view
        # choice, not a masked-store penalty.
        return (H, W)
    q = n // _LANES
    max_mult = max(1, _MAX_COLS // _LANES)
    cols_mult = 1
    for d in range(min(q, max_mult), 0, -1):
        if q % d == 0:
            cols_mult = d
            break
    cols = cols_mult * _LANES
    return (n // cols, cols)


def _hbm_copy(x2d: jax.Array) -> jax.Array:
    return pl.pallas_call(
        _dma_copy_kernel,
        out_shape=jax.ShapeDtypeStruct(x2d.shape, x2d.dtype),
        in_specs=[pl.BlockSpec(memory_space=pl.ANY)],
        out_specs=pl.BlockSpec(memory_space=pl.ANY),
        scratch_shapes=[pltpu.SemaphoreType.DMA(())],
    )(x2d)


def to_tensor(x: jax.Array) -> jax.Array:
    """Pallas equivalent of ToTensor.forward: (1, H, W) -> (1, 1, H, W), same dtype."""
    assert x.ndim == 3 and x.shape[0] == 1, x.shape
    _, H, W = x.shape
    n = H * W
    rows, cols = _lane_dense_shape(n, H, W)
    # Metadata-only view of the contiguous image as a lane-dense slab.
    x2d = x.reshape(rows, cols)
    y2d = _hbm_copy(x2d)
    # The unsqueeze (new leading batch dim) is a metadata-only reshape wrapper-side.
    return y2d.reshape(1, 1, H, W)


if __name__ == "__main__":
    key = jax.random.PRNGKey(0)

    # Primary test: small "numpy image"-like input, single channel, 128-divisible.
    H, W = 16, 16
    x = jax.random.normal(key, (1, H, W), dtype=jnp.float32)
    y = to_tensor(x)
    jax.block_until_ready(y)
    assert y.shape == (1, 1, H, W), y.shape
    assert y.dtype == x.dtype, (y.dtype, x.dtype)
    assert bool(jnp.all(y[0] == x)), "data mismatch"

    # Fallback-path test: H*W not divisible by 128 (keeps the (H, W) view).
    H2, W2 = 5, 7
    x2 = jax.random.normal(jax.random.PRNGKey(1), (1, H2, W2), dtype=jnp.float32)
    y2 = to_tensor(x2)
    jax.block_until_ready(y2)
    assert y2.shape == (1, 1, H2, W2), y2.shape
    assert y2.dtype == x2.dtype, (y2.dtype, x2.dtype)
    assert bool(jnp.all(y2[0] == x2)), "data mismatch (fallback path)"

    print("KERNEL_OK")
</pallas_src>

<mosaic_0001>
module attributes {stable_mosaic.version = 11 : i64} {
  func.func @_dma_copy_kernel(%arg0: memref<1x256xf32, #tpu.memory_space<any>>, %arg1: memref<1x256xf32, #tpu.memory_space<any>>, %arg2: memref<!tpu.dma_semaphore, #tpu.memory_space<semaphore_mem>>) attributes {dimension_semantics = [], scalar_prefetch = 0 : i64, scratch_operands = 1 : i64, tpu.core_type = #tpu.core_type<tc>} {
    tpu.enqueue_dma source(%arg0 : memref<1x256xf32, #tpu.memory_space<any>>) target(%arg1 : memref<1x256xf32, #tpu.memory_space<any>>) target_semaphore(%arg2 : memref<!tpu.dma_semaphore, #tpu.memory_space<semaphore_mem>>)
    tpu.wait_dma2 semaphore(%arg2 : memref<!tpu.dma_semaphore, #tpu.memory_space<semaphore_mem>>) src(%arg0 : memref<1x256xf32, #tpu.memory_space<any>>) dst(%arg1 : memref<1x256xf32, #tpu.memory_space<any>>)
    return
  }
}

</mosaic_0001>

<bundles_post_ra>
// kernel: tpu_custom_call.1
= control target key start
LH: loop header
LB: loop body
LE: loop exit
PB: predicated region body
PF: predicated region fallthrough
CT: control target
= control target key end

     0   :  { %s28_s6 = smov [#allocation2]   ;;  %s29_s7 = smov 131072   ;;  %s47_s0 = inlined_call_operand.hbm [shape: f32[1,256], index: 0, kind: input, shape index: {}]   ;;  %s48_s1 = inlined_call_operand.hbm [shape: f32[1,256], index: 1, kind: output, shape index: {}]  }
   0x1   :  { %s30_s8 = smov 0  }
   0x2   :  { %12 = dma.general %s47_s0, 32, %s48_s1, %s28_s6, %s29_s7, [#allocation4], %s30_s8, 0  }
   0x3   :  { %26 = dma.done.wait [#allocation2], 32 }
   0x4   :  { %27 = vsyncadd [#allocation2], 4294967264 }
   0x5   :  { %16 = vsyncmov [#allocation2] }
   0x8   :  { %s17_s13 = vpop.sfrf %16 }
   0x9   :  { %p22_p0 = scmp.ne.s32.totalorder %s17_s13, 0 }
   0xb   :  { %21 = shalt.err (%p22_p0)  }

</bundles_post_ra>
